<compile_context>
chip_gen: v7x
topology: tpu7x:2x2x1
jax: 0.10.0
libtpu: 0.0.40
codegen_flags: <defaults>
</compile_context>

<pallas_src>
import jax
import jax.numpy as jnp
from jax.experimental import pallas as pl
from jax.experimental.pallas import tpu as pltpu

LEAKY_SLOPE = 0.01  # LR default in ConvBlock
_LANE = 128


def _round_up(x, m):
    return (x + m - 1) // m * m


# ---------------------------------------------------------------------------
# Kernel
# ---------------------------------------------------------------------------
def _conv3x3_lrelu_kernel(x_ref, w_ref, o_ref):
    """One (batch, H-tile) block: 3x3 'same' conv (stride 1) + LeakyReLU(0.01).

    x_ref: (tile_h, W8, 9*Cin)  bf16 9-tap lane-packed input rows (VMEM)
    w_ref: (9*Cin, Cout)        bf16 packed weights (VMEM)
    o_ref: (tile_h, W8, Cout)   f32 output tile (VMEM)
    """
    tile_h, w8, cout = o_ref.shape
    cpk = x_ref.shape[-1]

    lhs = x_ref[...].reshape(tile_h * w8, cpk)          # layout-free (W8 % 8 == 0)
    acc = jax.lax.dot_general(
        lhs, w_ref[...],
        dimension_numbers=(((1,), (0,)), ((), ())),
        preferred_element_type=jnp.float32,
    )
    # TODO(synk): for large-channel configs (padded Cout >= 256) reshape the
    #             contraction to K/N >= 256 to fill the v6e/v7x 256x256 MXU.
    acc = jnp.where(acc > 0, acc, LEAKY_SLOPE * acc)    # LeakyReLU(0.01)
    o_ref[...] = acc.reshape(tile_h, w8, cout).astype(o_ref.dtype)


# ---------------------------------------------------------------------------
# VMEM budgeting / tiling (generation-aware, unified footprint formula)
# ---------------------------------------------------------------------------
def _vmem_budgets():
    try:
        cap = pltpu.get_tpu_info().vmem_capacity_bytes
    except Exception:
        cap = 64 * 2**20                      # conservative default (v7x-class)
    if cap <= 80 * 2**20:                     # v7x: 64 MiB per TensorCore
        return 20 * 2**20, 40 * 2**20         # (tile budget, vmem_limit cap)
    return 48 * 2**20, 96 * 2**20             # v5e / v6e: 128 MiB VMEM


def _footprint_bytes(tile_h, W8, cpk, cout):
    """Pipelined VMEM footprint: 2x-buffered in/out tiles + weights + temps."""
    in_b = tile_h * W8 * cpk * 2              # bf16 input tile
    out_b = tile_h * W8 * cout * 4            # f32 output tile
    w_b = cpk * cout * 2                      # bf16 weights
    return 3 * (in_b + out_b) + 2 * w_b       # double buffers + matmul/reshape temp


def _pick_tile_h(N, H, W8, cpk, cout, budget_bytes):
    in_row = W8 * cpk * 2
    out_row = W8 * cout * 4
    per_row = 3 * (in_row + out_row)
    fixed = 2 * (cpk * cout * 2)
    tile_h = int(max(1, min(H, (budget_bytes - fixed) // per_row)))
    # v7x has 2 TensorCores per chip: make sure there are >= 2 parallel steps.
    if N * pl.cdiv(H, tile_h) < 2 and H >= 2:
        tile_h = (H + 1) // 2
    return tile_h


# ---------------------------------------------------------------------------
# Forward wrappers
# ---------------------------------------------------------------------------
def conv_block_forward_nhwc(x_nhwc, weight_oihw, *, stride=1):
    """ConvBlock.forward (up=False), NHWC f32 in -> NHWC f32 out (Cout channels)."""
    assert stride == 1, "only stride=1 implemented"
    # TODO(synk): up=True path (align_corners bilinear upsample + F.pad + channel
    #             concat with x2) is module-level glue and is not implemented here.
    N, H, W, Cin = x_nhwc.shape
    Cout = weight_oihw.shape[0]
    assert weight_oihw.shape == (Cout, Cin, 3, 3)

    cpk = 9 * Cin
    if cpk > _LANE:
        # TODO(synk): for Cin > 14 fall back to kw-only lane packing with an
        #             H-halo'd BlockSpec instead of full 9-tap lane packing.
        raise NotImplementedError("9*Cin must fit the 128-lane axis (Cin <= 14)")

    W8 = _round_up(W, 8)                      # keep in-kernel reshape layout-free
    budget, limit_cap = _vmem_budgets()
    tile_h = _pick_tile_h(N, H, W8, cpk, Cout, budget)
    n_tiles = int(pl.cdiv(H, tile_h))
    Hp = n_tiles * tile_h

    # ---- wrapper glue: one pass building the 9-tap lane-packed bf16 input ----
    # xs[n, h, w, (dy*3+dx)*Cin + c] = x_pad[n, h+dy, w+dx, c]
    xb = x_nhwc.astype(jnp.bfloat16)
    x_pad = jnp.pad(xb, ((0, 0), (1, 1 + Hp - H), (1, 1 + W8 - W), (0, 0)))
    xs = jnp.concatenate(
        [x_pad[:, dy:dy + Hp, dx:dx + W8, :] for dy in range(3) for dx in range(3)],
        axis=-1)                                             # (N, Hp, W8, 9*Cin)

    # OIHW -> (kh, kw, Cin, Cout) -> (9*Cin, Cout) bf16; row order matches packing.
    w_packed = jnp.transpose(weight_oihw.astype(jnp.float32), (2, 3, 1, 0))
    w_packed = w_packed.reshape(cpk, Cout).astype(jnp.bfloat16)

    vmem_limit = int(min(limit_cap,
                         max(_footprint_bytes(tile_h, W8, cpk, Cout) + 4 * 2**20,
                             8 * 2**20)))

    out = pl.pallas_call(
        _conv3x3_lrelu_kernel,
        out_shape=jax.ShapeDtypeStruct((N, Hp, W8, Cout), jnp.float32),
        grid=(N, n_tiles),
        in_specs=[
            pl.BlockSpec((None, tile_h, W8, cpk), lambda b, t: (b, t, 0, 0)),
            pl.BlockSpec((cpk, Cout), lambda b, t: (0, 0)),
        ],
        out_specs=pl.BlockSpec((None, tile_h, W8, Cout), lambda b, t: (b, t, 0, 0)),
        compiler_params=pltpu.CompilerParams(
            dimension_semantics=("parallel", "parallel"),
            vmem_limit_bytes=vmem_limit,
        ),
    )(xs, w_packed)

    if Hp != H or W8 != W:
        out = out[:, :H, :W, :]
    return out


def conv_block_forward(x_nchw, weight_oihw, *, stride=1):
    """NCHW compatibility wrapper (matches the PyTorch module's layout).

    Prefer conv_block_forward_nhwc between stacked ConvBlocks so the two
    transposes disappear from the hot path.
    """
    y = conv_block_forward_nhwc(jnp.transpose(x_nchw, (0, 2, 3, 1)),
                                weight_oihw, stride=stride)
    return jnp.transpose(y, (0, 3, 1, 2)).astype(jnp.float32)


def spectral_norm_weight(w_bar_oihw, u, v, power_iterations=1, eps=1e-12):
    """SpectralNorm weight preprocessing (plain-JAX glue): w = w_bar / sigma."""
    Cout = w_bar_oihw.shape[0]
    w2d = w_bar_oihw.reshape(Cout, -1)
    for _ in range(power_iterations):
        v = w2d.T @ u
        v = v / (jnp.linalg.norm(v) + eps)
        u = w2d @ v
        u = u / (jnp.linalg.norm(u) + eps)
    sigma = jnp.dot(u, w2d @ v)
    return w_bar_oihw / sigma, u, v


def _reference(x_nchw, weight_oihw):
    """f32 XLA reference on bf16-rounded operands (same rounding as the kernel)."""
    xb = x_nchw.astype(jnp.bfloat16).astype(jnp.float32)
    wb = weight_oihw.astype(jnp.bfloat16).astype(jnp.float32)
    y = jax.lax.conv_general_dilated(
        xb, wb, window_strides=(1, 1), padding="SAME",
        dimension_numbers=("NCHW", "OIHW", "NCHW"),
        precision=jax.lax.Precision.HIGHEST)
    return jnp.where(y > 0, y, LEAKY_SLOPE * y)


if __name__ == "__main__":
    key = jax.random.PRNGKey(0)
    k_x, k_w, k_u, k_v = jax.random.split(key, 4)

    # Small shapes consistent with the module: batch=2, dim_in=4, dim_out=8, 16x16.
    N, Cin, H, W = 2, 4, 16, 16
    Cout = 8

    x = jax.random.normal(k_x, (N, Cin, H, W), dtype=jnp.float32)
    weight = jax.random.normal(k_w, (Cout, Cin, 3, 3), dtype=jnp.float32) * 0.1

    # --- default ConvBlock path (spec_norm=False, up=False) ---
    y = jax.block_until_ready(conv_block_forward(x, weight))
    y_ref = _reference(x, weight)
    assert y.shape == (N, Cout, H, W), y.shape
    max_err = float(jnp.max(jnp.abs(y - y_ref)))
    assert jnp.allclose(y, y_ref, atol=5e-4, rtol=5e-4), max_err

    # --- spec_norm=True variant (weight prep is glue, conv kernel identical) ---
    u0 = jax.random.normal(k_u, (Cout,), dtype=jnp.float32)
    v0 = jax.random.normal(k_v, (Cin * 9,), dtype=jnp.float32)
    u0 = u0 / (jnp.linalg.norm(u0) + 1e-12)
    v0 = v0 / (jnp.linalg.norm(v0) + 1e-12)
    w_sn, _, _ = spectral_norm_weight(weight, u0, v0, power_iterations=1)
    y_sn = jax.block_until_ready(conv_block_forward(x, w_sn))
    y_sn_ref = _reference(x, w_sn)
    max_err_sn = float(jnp.max(jnp.abs(y_sn - y_sn_ref)))
    assert jnp.allclose(y_sn, y_sn_ref, atol=5e-4, rtol=5e-4), max_err_sn

    print("KERNEL_OK")
</pallas_src>

<mosaic_0001>
module attributes {stable_mosaic.version = 11 : i64} {
  func.func @_conv3x3_lrelu_kernel(%arg0: i32, %arg1: i32, %arg2: memref<1x16x16x36xbf16, #tpu.memory_space<vmem>>, %arg3: memref<36x8xbf16, #tpu.memory_space<vmem>>, %arg4: memref<1x16x16x8xf32, #tpu.memory_space<vmem>>) attributes {dimension_semantics = [#tpu.dimension_semantics<parallel>, #tpu.dimension_semantics<parallel>], iteration_bounds = array<i64: 2, 1>, scalar_prefetch = 0 : i64, scratch_operands = 0 : i64, tpu.core_type = #tpu.core_type<tc>, window_params = [{transform_indices = @transform_0, window_bounds = array<i64: 1, 16, 16, 36>}, {pipeline_mode = #tpu.pipeline_mode<synchronous>, transform_indices = @transform_1, window_bounds = array<i64: 36, 8>}, {transform_indices = @transform_2, window_bounds = array<i64: 1, 16, 16, 8>}]} {
    %c0 = arith.constant 0 : index
    %c0_0 = arith.constant 0 : index
    %c0_1 = arith.constant 0 : index
    %c0_2 = arith.constant 0 : index
    %0 = vector.load %arg2[%c0, %c0_0, %c0_1, %c0_2] : memref<1x16x16x36xbf16, #tpu.memory_space<vmem>>, vector<1x16x16x36xbf16>
    %1 = vector.shape_cast %0 : vector<1x16x16x36xbf16> to vector<16x16x36xbf16>
    %2 = vector.shape_cast %1 : vector<16x16x36xbf16> to vector<256x36xbf16>
    %c0_3 = arith.constant 0 : index
    %c0_4 = arith.constant 0 : index
    %3 = vector.load %arg3[%c0_3, %c0_4] : memref<36x8xbf16, #tpu.memory_space<vmem>>, vector<36x8xbf16>
    %cst = arith.constant dense<0.000000e+00> : vector<256x8xf32>
    %4 = tpu.matmul %2, %3, %cst {dimension_numbers = #tpu.dot_dimension_numbers<[1], [0], [0], [1], [0, 0, 1, 1], [], []>} : vector<256x36xbf16>, vector<36x8xbf16>, vector<256x8xf32> -> vector<256x8xf32>
    %cst_5 = arith.constant 0.000000e+00 : f32
    %5 = vector.broadcast %cst_5 : f32 to vector<256x8xf32>
    %6 = arith.cmpf ogt, %4, %5 : vector<256x8xf32>
    %cst_6 = arith.constant 0.00999999977 : f32
    %7 = vector.broadcast %cst_6 : f32 to vector<256x8xf32>
    %8 = arith.mulf %7, %4 : vector<256x8xf32>
    %9 = arith.select %6, %4, %8 : vector<256x8xi1>, vector<256x8xf32>
    %10 = vector.shape_cast %9 : vector<256x8xf32> to vector<16x16x8xf32>
    %c0_7 = arith.constant 0 : index
    %c0_8 = arith.constant 0 : index
    %c0_9 = arith.constant 0 : index
    %c0_10 = arith.constant 0 : index
    %11 = vector.load %arg4[%c0_7, %c0_8, %c0_9, %c0_10] : memref<1x16x16x8xf32, #tpu.memory_space<vmem>>, vector<1x16x16x8xf32>
    %12 = vector.shape_cast %11 : vector<1x16x16x8xf32> to vector<16x16x8xf32>
    %13 = vector.shape_cast %10 : vector<16x16x8xf32> to vector<1x16x16x8xf32>
    tpu.vector_store %arg4[%c0_7, %c0_8, %c0_9, %c0_10], %13 {strides = array<i32>} : memref<1x16x16x8xf32, #tpu.memory_space<vmem>>, vector<1x16x16x8xf32>,
    return
  }
  func.func @transform_0(%arg0: i32, %arg1: i32) -> (i32, i32, i32, i32) {
    %c0_i32 = arith.constant 0 : i32
    %c0_i32_0 = arith.constant 0 : i32
    %c0_i32_1 = arith.constant 0 : i32
    return %arg0, %arg1, %c0_i32, %c0_i32_0 : i32, i32, i32, i32
  }
  func.func @transform_1(%arg0: i32, %arg1: i32) -> (i32, i32) {
    %c0_i32 = arith.constant 0 : i32
    %c0_i32_0 = arith.constant 0 : i32
    %c0_i32_1 = arith.constant 0 : i32
    return %c0_i32, %c0_i32_0 : i32, i32
  }
  func.func @transform_2(%arg0: i32, %arg1: i32) -> (i32, i32, i32, i32) {
    %c0_i32 = arith.constant 0 : i32
    %c0_i32_0 = arith.constant 0 : i32
    %c0_i32_1 = arith.constant 0 : i32
    return %arg0, %arg1, %c0_i32, %c0_i32_0 : i32, i32, i32, i32
  }
}

</mosaic_0001>

<bundles_post_ra>
// kernel: tpu_custom_call.1
= control target key start
LH: loop header
LB: loop body
LE: loop exit
PB: predicated region body
PF: predicated region fallthrough
CT: control target
= control target key end

     0   :  { %7 = vsyncpa [#allocation3], 0  ;;  %s1296_s0 = inlined_call_operand.hbm [shape: bf16[2,16,16,36], index: 0, kind: input, shape index: {}]   ;;  %s1297_s1 = inlined_call_operand.vmem [shape: bf16[36,8], index: 1, kind: input, shape index: {}]   ;;  %s1298_s2 = inlined_call_operand.vmem [shape: f32[2,16,16,8], index: 2, kind: output, shape index: {}]  }
   0x1   :  { %9 = vsyncpa [#allocation3 + $0x1], 0  ;;  %s1063_s9 = smov 0   ;;  %s1065_s10 = smov 0  }
   0x2   :  { %s1067_s11 = smov 0   ;;  %s1069_s12 = smov 0  }
   0x3   :  { %s1071_s13 = smov 0   ;;  %s1073_s14 = smov 0  }
   0x4 LB: > { %s772_s15 = sadd.s32 4294967295, %s1043_s14   ;;  %s27_s16 = sadd.s32 1, %s1039_s13  ;;  %s1043_s14 = sphi %s1073_s14, %s15_s14   ;;  %s1039_s13 = sphi %s1071_s13, %s1306_s13   ;;  %s1035_s12 = sphi %s1069_s12, %s1305_s12   ;;  %s1031_s11 = sphi %s1067_s11, %s1304_s11   ;;  %s1027_s10 = sphi %s1065_s10, %s1303_s10   ;;  %s1023_s9 = sphi %s1063_s9, %s1302_s9  }
   0x5   : > { %p29_p0 = scmp.ge.s32.totalorder %s27_s16, 2  ;;  %s36_s17 = sadd.s32 1, %s1031_s11 }
   0x6   : > { %p43_p1 = scmp.ne.s32.totalorder %s1031_s11, %s1027_s10  ;;  %p44_p2 = scmp.eq.s32.totalorder %s1043_s14, 0 }
   0x7   : > { %s1308_s16 = smov (%p29_p0, %s27_s16), 0  ;;  %p49_p4 = scmp.ne.s32.totalorder %s1027_s10, %s1023_s9 }
   0x8   : > { %p1099_p3 = por %p44_p2, %p43_p1  ;;  %s31_s19 = ssub.s32 %s1039_s13, %s1308_s16 }
   0x9   : > { %p50_p5 = scmp.eq.s32.totalorder %s772_s15, 0  ;;  %p34_p6 = scmp.eq.s32.totalorder %s31_s19, 0 }
   0xa   : > { %p893_p8 = scmp.lt.s32.totalorder %s1043_s14, 2  ;;  %s125_s22 = sand.u32 1, %s1031_s11  }
   0xb   : > { %p1106_p7 = por %p50_p5, %p49_p4  ;;  %s820_s23 = sshll.u32 %s1039_s13, 11 }
   0xc   : > { %s1112_s21 = scalar_select %p34_p6, %s1031_s11, %s36_s17  }
   0xd   : > { %s776_s24 = sshll.u32 %s125_s22, 7  ;;  %s1119_s27 = scalar_lea.hbm %s1296_s0, %s820_s23 }
   0xe   : > { %s129_s28 = scalar_lea.vmem [#allocation2], %s776_s24  ;;  %p1123_p9 = pnand %p893_p8, %p1099_p3 }
   0xf   : > { %s139_s29 = sshll.u32 %s129_s28, 4  ;;  %s1129_s3 = scalar_lea.sflag [#allocation3], %s125_s22  ;;  %s1127_s29 = int_to_ptr.vmem [resolvable:$true] %s139_s29 }
  0x10   : > { %s963_s4 = scalar_lea.hbm %s1119_s27, 2048  ;;  %p965_p11 = pneg %p1123_p9 }
  0x11   : > { %p964_p10 = scmp.ne.s32.totalorder %s1119_s27, %s963_s4  ;;  %s968_s7 = scalar_lea.hbm %s1296_s0, 4096 }
  0x12   : > { %p969_p0 = scmp.lt.u32.totalorder %s1119_s27, %s1296_s0  ;;  %p970_p1 = scmp.lt.u32.totalorder %s968_s7, %s963_s4 }
  0x13   : > { %p966_p12 = pnand %p965_p11, %p964_p10  ;;  %p972_p3 = scmp.lt.u32.totalorder %s963_s4, %s1119_s27 }
  0x14   : > { %p971_p2 = por %p970_p1, %p969_p0 }
  0x15   : > { %p967_p13 = pneg %p966_p12 }
  0x16   : > { %p973_p4 = por %p972_p3, %p971_p2 }
  0x18   : > { %p974_p5 = pnand %p973_p4, %p967_p13 }
  0x1a   : > { %977 = shalt.err (!%p974_p5)
}
  0x1b   : > { %s978_s15 = scalar_lea.vmem %s1127_s29, 2048  ;;  %s1045_s17 = smov [#allocation2]  }
  0x1c   : > { %p979_p6 = scmp.ne.s32.totalorder %s1127_s29, %s978_s15  ;;  %s983_s18 = sshll.u32 %s1045_s17, 4  ;;  %s984_s18 = int_to_ptr.vmem [resolvable:$false] %s983_s18 }
  0x1d   : > { %s985_s19 = scalar_lea.vmem %s984_s18, 4096  ;;  %p986_p12 = scmp.lt.s32.totalorder %s1127_s29, %s984_s18 }
  0x1e   : > { %p981_p8 = pnand %p979_p6, %p965_p11  ;;  %p987_p0 = scmp.lt.s32.totalorder %s985_s19, %s978_s15 }
  0x20   : > { %p982_p10 = pneg %p981_p8  ;;  %p988_p1 = por %p987_p0, %p986_p12 }
  0x22   : > { %p989_p2 = pnand %p988_p1, %p982_p10 }
  0x24   : > { %992 = shalt.err (!%p989_p2)
}
  0x25   : > { %s1046_s22 = smov 64   ;;  %s1047_s23 = smov 4  }
  0x26   : > { %892 = dma.hbm_to_vmem [thread:$0]  (!%p1123_p9), %s1119_s27, 2048, %s1127_s29, %s1129_s3, %s1046_s22, %s1046_s22, %s1047_s23  }
  0x27   : > { %p779_p11 = scmp.ge.s32.totalorder %s1043_s14, 1  ;;  %p147_p13 = scmp.lt.s32.totalorder %s1043_s14, 3 }
  0x29   : > { %p148_p3 = pnand %p779_p11, %p147_p13 }
  0x2a   : > { %s153_s24 = sand.u32 (!%p148_p3), 1, %s1027_s10  }
  0x2b   : > { %151 = sbr.rel (%p148_p3) target bundleno = 310 (0x136), region = 28  ;;  %s780_s25 = sshll.u32 (!%p148_p3), %s153_s24, 7 }
  0x2c   : > { %s154_s26 = scalar_lea.sflag (!%p148_p3), [#allocation3], %s153_s24  ;;  %s1160_s28 = scalar_lea.vmem (!%p148_p3), [#allocation2], %s780_s25 }
  0x32   : > { %1018 = dma.done.wait (%p1106_p7), %s154_s26, 2048  }
  0x33   : > { %1020 = vsyncadd (%p1106_p7), %s154_s26, 4294965248  ;;  %v944_v0 = vld [vmem:[%s1297_s1] sm:$0xff]   ;;  %v945_v1 = vld [vmem:[%s1297_s1 + $0x8] sm:$0xff]   ;;  %vm328_vm0 = vcmask 293888   ;;  %vm377_vm1 = vcmask 1041408   ;;  %p185_p7 = scmp.lt.s32.totalorder %s1035_s12, 1 }
  0x34   : > { %841 = vmatprep.subr.bf16.mxu0 %v944_v0  ;;  %879 = vmatprep.subr.bf16.mxu1 %v944_v0  ;;  %v946_v2 = vld [vmem:[%s1297_s1 + $0x10] ss:$0 sps:$4 sm:$0x33]   ;;  %v947_v3 = vld [vmem:[%s1160_s28] sm:$0xff]   ;;  %v949_v6 = vld [vmem:[%s1160_s28 + $0x8] sm:$0xff]   ;;  %vm638_vm2 = vcmask 64512  }
  0x35   : > { %842 = vmatpush3.bf16.msra.mxu0 %v944_v0  ;;  %882 = vmatpush3.bf16.msra.mxu1 %v944_v0  ;;  %v948_v4 = vld [vmem:[%s1160_s28 + $0x40] sm:$0xff]   ;;  %v379_v5 = vsel %vm377_vm1, %v946_v2, 0  ;;  %v950_v7 = vld [vmem:[%s1160_s28 + $0x48] sm:$0xff]   ;;  %v951_v8 = vld [vmem:[%s1160_s28 + $0x10] sm:$0xff]   ;;  %s1310_s12 = smov (!%p185_p7, %s1035_s12), 1 }
  0x36   : > { %843 = vmatprep.subr.bf16.mxu0 %v945_v1  ;;  %880 = vmatprep.subr.bf16.mxu1 %v945_v1  ;;  %v952_v9 = vld [vmem:[%s1160_s28 + $0x50] sm:$0xff]   ;;  %v953_v10 = vld [vmem:[%s1160_s28 + $0x18] sm:$0xff]   ;;  %v955_v12 = vld [vmem:[%s1160_s28 + $0x20] sm:$0xff]   ;;  %s821_s20 = sshll.u32 %s1310_s12, 8 }
  0x37   : > { %847 = vmatprep.mubr.msk.bf16.mxu0 %vm328_vm0, %v947_v3  ;;  %863 = vmatprep.mubr.msk.bf16.mxu1 %vm328_vm0, %v948_v4  ;;  %v954_v11 = vld [vmem:[%s1160_s28 + $0x58] sm:$0xff]   ;;  %v956_v13 = vld [vmem:[%s1160_s28 + $0x60] sm:$0xff]   ;;  %v957_v14 = vld [vmem:[%s1160_s28 + $0x28] sm:$0xff]   ;;  %s1212_s8 = scalar_lea.vmem %s1298_s2, %s821_s20 }
  0x38   : > { %v958_v15 = vld [vmem:[%s1160_s28 + $0x68] sm:$0xff]   ;;  %v959_v16 = vld [vmem:[%s1160_s28 + $0x30] sm:$0xff]   ;;  %v961_v18 = vld [vmem:[%s1160_s28 + $0x38] sm:$0xff]  }
  0x39   : > { %844 = vmatpush3.bf16.msra.mxu0 %v945_v1  ;;  %883 = vmatpush3.bf16.msra.mxu1 %v945_v1  ;;  %v960_v17 = vld [vmem:[%s1160_s28 + $0x70] sm:$0xff]   ;;  %v962_v19 = vld [vmem:[%s1160_s28 + $0x78] sm:$0xff]  }
  0x3a   : > { %885 = vmatprep.subr.msk.bf16.mxu0 %vm377_vm1, %v946_v2  ;;  %886 = vmatprep.subr.msk.bf16.mxu1 %vm377_vm1, %v946_v2 }
  0x3d   : > { %846 = vmatpush3.bf16.msra.mxu0 %v379_v5  ;;  %884 = vmatpush3.bf16.msra.mxu1 %v379_v5 }
  0x40   : > { %848 = vmatmul.mubr.msk.bf16.vlgmr.msra.gmra.mrb[0].mxu0 %vm328_vm0, %v949_v6  ;;  %864 = vmatmul.mubr.msk.bf16.vlgmr.msra.gmra.mrb[0].mxu1 %vm328_vm0, %v950_v7 }
  0x41   : > { %851 = vmatprep.mubr.msk.bf16.mxu0 %vm328_vm0, %v951_v8  ;;  %867 = vmatprep.mubr.msk.bf16.mxu1 %vm328_vm0, %v952_v9 }
  0x48   : > { %852 = vmatmul.mubr.msk.bf16.gmra.mrb[4].mxu0 %vm328_vm0, %v953_v10  ;;  %868 = vmatmul.mubr.msk.bf16.gmra.mrb[4].mxu1 %vm328_vm0, %v954_v11 }
  0x49   : > { %855 = vmatprep.mubr.msk.bf16.mxu0 %vm328_vm0, %v955_v12  ;;  %871 = vmatprep.mubr.msk.bf16.mxu1 %vm328_vm0, %v956_v13 }
  0x50   : > { %856 = vmatmul.mubr.msk.bf16.gmra.mrb[8].mxu0 %vm328_vm0, %v957_v14  ;;  %872 = vmatmul.mubr.msk.bf16.gmra.mrb[8].mxu1 %vm328_vm0, %v958_v15 }
  0x51   : > { %859 = vmatprep.mubr.msk.bf16.mxu0 %vm328_vm0, %v959_v16  ;;  %875 = vmatprep.mubr.msk.bf16.mxu1 %vm328_vm0, %v960_v17 }
  0x58   : > { %860 = vmatmul.mubr.msk.bf16.gmra.mrb[12].mxu0 %vm328_vm0, %v961_v18  ;;  %876 = vmatmul.mubr.msk.bf16.gmra.mrb[12].mxu1 %vm328_vm0, %v962_v19 }
 0x113   : > { %v849_v20 = vpop.f32.mrb[0].mxu0  ;;  %v865_v21 = vpop.f32.mrb[0].mxu1 }
 0x114   : > { %vm544_vm3 = vcmp.gt.f32.partialorder %v849_v20, 0.0  ;;  %v576_v22 = vmul.f32 0.01, %v849_v20  ;;  %vm560_vm4 = vcmp.gt.f32.partialorder %v865_v21, 0.0  ;;  %v592_v23 = vmul.f32 0.01, %v865_v21 }
 0x115   : > { %v415_v24 = vpop.f32.mrb[1].mxu0  ;;  %v479_v25 = vpop.f32.mrb[1].mxu1 }
 0x116   : > { %v608_v26 = vsel %vm544_vm3, %v849_v20, %v576_v22  ;;  %v624_v27 = vsel %vm560_vm4, %v865_v21, %v592_v23  ;;  %vm542_vm5 = vcmp.gt.f32.partialorder %v415_v24, 0.0  ;;  %v574_v28 = vmul.f32 0.01, %v415_v24  ;;  %v850_v29 = vpop.f32.mrb[2].mxu0  ;;  %v866_v30 = vpop.f32.mrb[2].mxu1 }
 0x117   : > { %641 = vst.msk [vmem:[%s1212_s8 + $0x10] sm:$0xff] %vm638_vm2, %v608_v26  ;;  %657 = vst.msk [vmem:[%s1212_s8 + $0x90] sm:$0xff] %vm638_vm2, %v624_v27  ;;  %vm558_vm6 = vcmp.gt.f32.partialorder %v479_v25, 0.0  ;;  %v590_v31 = vmul.f32 0.01, %v479_v25  ;;  %vm545_vm7 = vcmp.gt.f32.partialorder %v850_v29, 0.0 }
 0x118   : > { %v577_v32 = vmul.f32 0.01, %v850_v29  ;;  %v606_v33 = vsel %vm542_vm5, %v415_v24, %v574_v28  ;;  %vm561_vm8 = vcmp.gt.f32.partialorder %v866_v30, 0.0  ;;  %v593_v34 = vmul.f32 0.01, %v866_v30  ;;  %v418_v35 = vpop.f32.mrb[3].mxu0 }
 0x119   : > { %v482_v36 = vpop.f32.mrb[3].mxu1  ;;  %639 = vst.msk [vmem:[%s1212_s8] sm:$0xff] %vm638_vm2, %v606_v33  ;;  %v622_v37 = vsel %vm558_vm6, %v479_v25, %v590_v31  ;;  %vm543_vm9 = vcmp.gt.f32.partialorder %v418_v35, 0.0  ;;  %v575_v39 = vmul.f32 0.01, %v418_v35 }
 0x11a   : > { %v609_v38 = vsel %vm545_vm7, %v850_v29, %v577_v32  ;;  %655 = vst.msk [vmem:[%s1212_s8 + $0x80] sm:$0xff] %vm638_vm2, %v622_v37  ;;  %v625_v40 = vsel %vm561_vm8, %v866_v30, %v593_v34  ;;  %vm559_vm10 = vcmp.gt.f32.partialorder %v482_v36, 0.0  ;;  %v591_v41 = vmul.f32 0.01, %v482_v36 }
 0x11b   : > { %642 = vst.msk [vmem:[%s1212_s8 + $0x18] sm:$0xff] %vm638_vm2, %v609_v38  ;;  %658 = vst.msk [vmem:[%s1212_s8 + $0x98] sm:$0xff] %vm638_vm2, %v625_v40  ;;  %v607_v42 = vsel %vm543_vm9, %v418_v35, %v575_v39  ;;  %v853_v43 = vpop.f32.mrb[4].mxu0  ;;  %v869_v44 = vpop.f32.mrb[4].mxu1 }
 0x11c   : > { %640 = vst.msk [vmem:[%s1212_s8 + $0x8] sm:$0xff] %vm638_vm2, %v607_v42  ;;  %v623_v45 = vsel %vm559_vm10, %v482_v36, %v591_v41  ;;  %vm548_vm11 = vcmp.gt.f32.partialorder %v853_v43, 0.0  ;;  %v580_v46 = vmul.f32 0.01, %v853_v43  ;;  %vm564_vm12 = vcmp.gt.f32.partialorder %v869_v44, 0.0  ;;  %v431_v47 = vpop.f32.mrb[5].mxu0 }
 0x11d   : > { %v495_v48 = vpop.f32.mrb[5].mxu1  ;;  %656 = vst.msk [vmem:[%s1212_s8 + $0x88] sm:$0xff] %vm638_vm2, %v623_v45  ;;  %v596_v49 = vmul.f32 0.01, %v869_v44  ;;  %vm546_vm13 = vcmp.gt.f32.partialorder %v431_v47, 0.0  ;;  %v854_v53 = vpop.f32.mrb[6].mxu0 }
 0x11e   : > { %v578_v50 = vmul.f32 0.01, %v431_v47  ;;  %vm562_vm14 = vcmp.gt.f32.partialorder %v495_v48, 0.0  ;;  %v612_v51 = vsel %vm548_vm11, %v853_v43, %v580_v46  ;;  %v594_v52 = vmul.f32 0.01, %v495_v48  ;;  %v870_v54 = vpop.f32.mrb[6].mxu1 }
 0x11f   : > { %645 = vst.msk [vmem:[%s1212_s8 + $0x30] sm:$0xff] %vm638_vm2, %v612_v51  ;;  %v628_v55 = vsel %vm564_vm12, %v869_v44, %v596_v49  ;;  %vm549_vm15 = vcmp.gt.f32.partialorder %v854_v53, 0.0  ;;  %v581_v57 = vmul.f32 0.01, %v854_v53  ;;  %v434_v58 = vpop.f32.mrb[7].mxu0  ;;  %v498_v59 = vpop.f32.mrb[7].mxu1 }
 0x120   : > { %v610_v56 = vsel %vm546_vm13, %v431_v47, %v578_v50  ;;  %661 = vst.msk [vmem:[%s1212_s8 + $0xb0] sm:$0xff] %vm638_vm2, %v628_v55  ;;  %v626_v60 = vsel %vm562_vm14, %v495_v48, %v594_v52  ;;  %vm565_vm0 = vcmp.gt.f32.partialorder %v870_v54, 0.0  ;;  %v597_v61 = vmul.f32 0.01, %v870_v54 }
 0x121   : > { %643 = vst.msk [vmem:[%s1212_s8 + $0x20] sm:$0xff] %vm638_vm2, %v610_v56  ;;  %vm547_vm1 = vcmp.gt.f32.partialorder %v434_v58, 0.0  ;;  %659 = vst.msk [vmem:[%s1212_s8 + $0xa0] sm:$0xff] %vm638_vm2, %v626_v60  ;;  %v613_v62 = vsel %vm549_vm15, %v854_v53, %v581_v57  ;;  %v579_v63 = vmul.f32 0.01, %v434_v58  ;;  %vm563_vm3 = vcmp.gt.f32.partialorder %v498_v59, 0.0 }
 0x122   : > { %v595_v0 = vmul.f32 0.01, %v498_v59  ;;  %646 = vst.msk [vmem:[%s1212_s8 + $0x38] sm:$0xff] %vm638_vm2, %v613_v62  ;;  %v629_v1 = vsel %vm565_vm0, %v870_v54, %v597_v61 }
 0x123   : > { %662 = vst.msk [vmem:[%s1212_s8 + $0xb8] sm:$0xff] %vm638_vm2, %v629_v1  ;;  %v611_v2 = vsel %vm547_vm1, %v434_v58, %v579_v63  ;;  %v857_v4 = vpop.f32.mrb[8].mxu0  ;;  %v873_v5 = vpop.f32.mrb[8].mxu1 }
 0x124   : > { %v627_v3 = vsel %vm563_vm3, %v498_v59, %v595_v0  ;;  %644 = vst.msk [vmem:[%s1212_s8 + $0x28] sm:$0xff] %vm638_vm2, %v611_v2  ;;  %vm552_vm4 = vcmp.gt.f32.partialorder %v857_v4, 0.0  ;;  %v584_v6 = vmul.f32 0.01, %v857_v4  ;;  %vm568_vm5 = vcmp.gt.f32.partialorder %v873_v5, 0.0  ;;  %v447_v8 = vpop.f32.mrb[9].mxu0 }
 0x125   : > { %660 = vst.msk [vmem:[%s1212_s8 + $0xa8] sm:$0xff] %vm638_vm2, %v627_v3  ;;  %v600_v7 = vmul.f32 0.01, %v873_v5  ;;  %v511_v9 = vpop.f32.mrb[9].mxu1  ;;  %vm550_vm6 = vcmp.gt.f32.partialorder %v447_v8, 0.0  ;;  %v858_v13 = vpop.f32.mrb[10].mxu0 }
 0x126   : > { %v616_v10 = vsel %vm552_vm4, %v857_v4, %v584_v6  ;;  %v582_v12 = vmul.f32 0.01, %v447_v8  ;;  %v874_v14 = vpop.f32.mrb[10].mxu1  ;;  %vm566_vm7 = vcmp.gt.f32.partialorder %v511_v9, 0.0  ;;  %v598_v15 = vmul.f32 0.01, %v511_v9 }
 0x127   : > { %v632_v11 = vsel %vm568_vm5, %v873_v5, %v600_v7  ;;  %649 = vst.msk [vmem:[%s1212_s8 + $0x50] sm:$0xff] %vm638_vm2, %v616_v10  ;;  %vm553_vm8 = vcmp.gt.f32.partialorder %v858_v13, 0.0  ;;  %v585_v16 = vmul.f32 0.01, %v858_v13  ;;  %vm569_vm9 = vcmp.gt.f32.partialorder %v874_v14, 0.0  ;;  %v450_v19 = vpop.f32.mrb[11].mxu0 }
 0x128   : > { %665 = vst.msk [vmem:[%s1212_s8 + $0xd0] sm:$0xff] %vm638_vm2, %v632_v11  ;;  %v614_v17 = vsel %vm550_vm6, %v447_v8, %v582_v12  ;;  %v601_v18 = vmul.f32 0.01, %v874_v14  ;;  %v514_v20 = vpop.f32.mrb[11].mxu1  ;;  %v630_v21 = vsel %vm566_vm7, %v511_v9, %v598_v15  ;;  %vm551_vm10 = vcmp.gt.f32.partialorder %v450_v19, 0.0 }
 0x129   : > { %647 = vst.msk [vmem:[%s1212_s8 + $0x40] sm:$0xff] %vm638_vm2, %v614_v17  ;;  %v617_v22 = vsel %vm553_vm8, %v858_v13, %v585_v16  ;;  %v583_v23 = vmul.f32 0.01, %v450_v19  ;;  %663 = vst.msk [vmem:[%s1212_s8 + $0xc0] sm:$0xff] %vm638_vm2, %v630_v21  ;;  %vm567_vm11 = vcmp.gt.f32.partialorder %v514_v20, 0.0 }
 0x12a   : > { %650 = vst.msk [vmem:[%s1212_s8 + $0x58] sm:$0xff] %vm638_vm2, %v617_v22  ;;  %v633_v24 = vsel %vm569_vm9, %v874_v14, %v601_v18  ;;  %v599_v25 = vmul.f32 0.01, %v514_v20 }
 0x12b   : > { %666 = vst.msk [vmem:[%s1212_s8 + $0xd8] sm:$0xff] %vm638_vm2, %v633_v24  ;;  %v615_v26 = vsel %vm551_vm10, %v450_v19, %v583_v23  ;;  %v861_v27 = vpop.f32.mrb[12].mxu0  ;;  %v877_v28 = vpop.f32.mrb[12].mxu1 }
 0x12c   : > { %648 = vst.msk [vmem:[%s1212_s8 + $0x48] sm:$0xff] %vm638_vm2, %v615_v26  ;;  %v631_v29 = vsel %vm567_vm11, %v514_v20, %v599_v25  ;;  %vm556_vm12 = vcmp.gt.f32.partialorder %v861_v27, 0.0  ;;  %v588_v30 = vmul.f32 0.01, %v861_v27  ;;  %vm572_vm13 = vcmp.gt.f32.partialorder %v877_v28, 0.0  ;;  %v463_v31 = vpop.f32.mrb[13].mxu0 }
 0x12d   : > { %v527_v32 = vpop.f32.mrb[13].mxu1  ;;  %664 = vst.msk [vmem:[%s1212_s8 + $0xc8] sm:$0xff] %vm638_vm2, %v631_v29  ;;  %v604_v33 = vmul.f32 0.01, %v877_v28  ;;  %vm554_vm14 = vcmp.gt.f32.partialorder %v463_v31, 0.0  ;;  %v862_v37 = vpop.f32.mrb[14].mxu0 }
 0x12e   : > { %v586_v34 = vmul.f32 0.01, %v463_v31  ;;  %vm570_vm15 = vcmp.gt.f32.partialorder %v527_v32, 0.0  ;;  %v620_v35 = vsel %vm556_vm12, %v861_v27, %v588_v30  ;;  %v602_v36 = vmul.f32 0.01, %v527_v32  ;;  %v878_v38 = vpop.f32.mrb[14].mxu1 }
 0x12f   : > { %653 = vst.msk [vmem:[%s1212_s8 + $0x70] sm:$0xff] %vm638_vm2, %v620_v35  ;;  %v636_v39 = vsel %vm572_vm13, %v877_v28, %v604_v33  ;;  %vm557_vm0 = vcmp.gt.f32.partialorder %v862_v37, 0.0  ;;  %v589_v41 = vmul.f32 0.01, %v862_v37  ;;  %v466_v42 = vpop.f32.mrb[15].mxu0  ;;  %v530_v43 = vpop.f32.mrb[15].mxu1 }
 0x130   : > { %v618_v40 = vsel %vm554_vm14, %v463_v31, %v586_v34  ;;  %669 = vst.msk [vmem:[%s1212_s8 + $0xf0] sm:$0xff] %vm638_vm2, %v636_v39  ;;  %v634_v44 = vsel %vm570_vm15, %v527_v32, %v602_v36  ;;  %vm573_vm1 = vcmp.gt.f32.partialorder %v878_v38, 0.0  ;;  %v605_v45 = vmul.f32 0.01, %v878_v38 }
 0x131   : > { %651 = vst.msk [vmem:[%s1212_s8 + $0x60] sm:$0xff] %vm638_vm2, %v618_v40  ;;  %vm555_vm3 = vcmp.gt.f32.partialorder %v466_v42, 0.0  ;;  %667 = vst.msk [vmem:[%s1212_s8 + $0xe0] sm:$0xff] %vm638_vm2, %v634_v44  ;;  %v621_v46 = vsel %vm557_vm0, %v862_v37, %v589_v41  ;;  %v587_v47 = vmul.f32 0.01, %v466_v42  ;;  %vm571_vm4 = vcmp.gt.f32.partialorder %v530_v43, 0.0 }
 0x132   : > { %v603_v48 = vmul.f32 0.01, %v530_v43  ;;  %654 = vst.msk [vmem:[%s1212_s8 + $0x78] sm:$0xff] %vm638_vm2, %v621_v46  ;;  %v637_v49 = vsel %vm573_vm1, %v878_v38, %v605_v45 }
 0x133   : > { %670 = vst.msk [vmem:[%s1212_s8 + $0xf8] sm:$0xff] %vm638_vm2, %v637_v49  ;;  %v619_v50 = vsel %vm555_vm3, %v466_v42, %v587_v47 }
 0x134   : > { %v635_v51 = vsel %vm571_vm4, %v530_v43, %v603_v48  ;;  %652 = vst.msk [vmem:[%s1212_s8 + $0x68] sm:$0xff] %vm638_vm2, %v619_v50 }
 0x135   : > { %668 = vst.msk [vmem:[%s1212_s8 + $0xe8] sm:$0xff] %vm638_vm2, %v635_v51 }
 0x136 PF: > { %s15_s14 = sadd.s32 1, %s1043_s14   ;;  %s1302_s9 = smov %s1027_s10 }
 0x137   : > { %p12_p9 = scmp.ge.s32.totalorder %s15_s14, 4   ;;  %s1303_s10 = smov %s1031_s11 }
 0x138   : > { %s1304_s11 = smov %s1112_s21  ;;  %s1305_s12 = smov %s1039_s13 }
 0x139   : > { %s1306_s13 = smov %s1308_s16  ;;  %14 = sbr.rel (!%p12_p9) target bundleno = 4 (0x4), region = 68 }
 0x140   :  { %703 = vsyncpa [#allocation3], 1 }
 0x141   :  { %705 = vsyncpa [#allocation3 + $0x1], 1 }

</bundles_post_ra>
